<compile_context>
chip_gen: v7x
topology: tpu7x:2x2x1
jax: 0.10.0
libtpu: 0.0.40
codegen_flags: <defaults>
</compile_context>

<pallas_src>
import functools

import jax
import jax.numpy as jnp
from jax.experimental import pallas as pl
from jax.experimental.pallas import tpu as pltpu


def _spectral_mul_kernel(xr_ref, xi_ref, wr_ref, wi_ref, or_ref, oi_ref):
    # Block shapes:
    #   xr/xi : (TB, I, M)   wr/wi : (I, TO, M)   or/oi : (TB, TO, M)
    num_in = wr_ref.shape[0]

    acc_r = jnp.zeros(or_ref.shape, jnp.float32)
    acc_i = jnp.zeros(oi_ref.shape, jnp.float32)

    # Unrolled FMA loop over input channels (I is a small compile-time constant
    # for FNO layers; for very large Cin switch this to lax.fori_loop).
    # Only (TB, TO, M)-sized temporaries are ever live — the rank-4
    # (TB, I, TO, M) broadcast is never materialized.
    for i in range(num_in):
        xr_i = xr_ref[:, i, :][:, None, :]        # (TB, 1, M)
        xi_i = xi_ref[:, i, :][:, None, :]        # (TB, 1, M)
        wr_i = wr_ref[i][None, :, :]              # (1, TO, M)
        wi_i = wi_ref[i][None, :, :]              # (1, TO, M)
        # Gauss 3-mult complex product:
        #   real = k1 - xi*(wr+wi),  imag = k1 + xr*(wi-wr),  k1 = wr*(xr+xi)
        k1 = wr_i * (xr_i + xi_i)                 # (TB, TO, M)
        acc_r = acc_r + (k1 - xi_i * (wr_i + wi_i))
        acc_i = acc_i + (k1 + xr_i * (wi_i - wr_i))

    or_ref[...] = acc_r
    oi_ref[...] = acc_i


def _divisor_tile(n, pref):
    """Largest t <= pref that divides n (batch tile — no sublane constraint)."""
    t = max(1, min(pref, n))
    while n % t:
        t -= 1
    return t


def _sublane_tile(n, pref):
    """Tile for a second-to-last dim: multiple of 8 dividing n, else full n."""
    if n % 8 == 0:
        t = min(pref, n)
        t -= t % 8
        t = max(t, 8)
        while n % t:
            t -= 8
        return t
    return n


def spectral_mul(xr, xi, wr, wi):
    """Complex contraction 'bim,iom->bom' (m = flattened, lane-padded modes)."""
    B, I, M = xr.shape
    _, O, _ = wr.shape
    assert M % 128 == 0, "mode dim must be lane-padded to a multiple of 128"

    TB = _divisor_tile(B, 8)        # batch tile
    TO = _sublane_tile(O, 16)       # out-channel tile (sublane-dim constraint)

    grid = (B // TB, O // TO)

    x_spec = pl.BlockSpec((TB, I, M), lambda b, o: (b, 0, 0))
    w_spec = pl.BlockSpec((I, TO, M), lambda b, o: (0, o, 0))
    o_spec = pl.BlockSpec((TB, TO, M), lambda b, o: (b, o, 0))

    out_elems = B * O * M
    cost = pl.CostEstimate(
        flops=8 * B * I * O * M,                  # ~8 flops per complex MAC
        transcendentals=0,
        bytes_accessed=4 * (xr.size + xi.size + wr.size + wi.size + 2 * out_elems),
    )

    return pl.pallas_call(
        _spectral_mul_kernel,
        grid=grid,
        in_specs=[x_spec, x_spec, w_spec, w_spec],
        out_specs=(o_spec, o_spec),
        out_shape=(jax.ShapeDtypeStruct((B, O, M), jnp.float32),
                   jax.ShapeDtypeStruct((B, O, M), jnp.float32)),
        compiler_params=pltpu.CompilerParams(
            dimension_semantics=("parallel", "parallel"),
            vmem_limit_bytes=32 * 1024 * 1024,
        ),
        cost_estimate=cost,
    )(xr, xi, wr, wi)


@functools.partial(jax.jit, static_argnames=("modes1", "modes2"))
def spectral_conv2d(x, w1_r, w1_i, w2_r, w2_i, modes1, modes2):
    """Forward pass matching PyTorch SpectralConv2d.forward semantics."""
    B, Cin, H, W = x.shape
    Cout = w1_r.shape[1]
    mm = modes1 * modes2
    mm2 = 2 * mm                                   # top block + bottom block
    mm_pad = ((mm2 + 127) // 128) * 128            # lane-dense mode dimension

    # TODO(synk): FFT has no Pallas primitive on TPU; computed with jnp.fft (glue).
    x_ft = jnp.fft.rfft2(x)                        # (B, Cin, H, W//2+1) complex64

    top = x_ft[:, :, :modes1, :modes2].reshape(B, Cin, mm)
    bot = x_ft[:, :, H - modes1:, :modes2].reshape(B, Cin, mm)
    x_modes = jnp.concatenate([top, bot], axis=-1)            # (B, Cin, 2*mm)

    xr = jnp.real(x_modes).astype(jnp.float32)
    xi = jnp.imag(x_modes).astype(jnp.float32)

    w_r = jnp.concatenate([w1_r.reshape(Cin, Cout, mm),
                           w2_r.reshape(Cin, Cout, mm)], axis=-1).astype(jnp.float32)
    w_i = jnp.concatenate([w1_i.reshape(Cin, Cout, mm),
                           w2_i.reshape(Cin, Cout, mm)], axis=-1).astype(jnp.float32)

    pad = mm_pad - mm2
    if pad:
        pad_cfg = ((0, 0), (0, 0), (0, pad))
        xr = jnp.pad(xr, pad_cfg)
        xi = jnp.pad(xi, pad_cfg)
        w_r = jnp.pad(w_r, pad_cfg)
        w_i = jnp.pad(w_i, pad_cfg)

    out_r, out_i = spectral_mul(xr, xi, w_r, w_i)              # (B, Cout, mm_pad)

    out_modes = (out_r[..., :mm2] + 1j * out_i[..., :mm2]).astype(jnp.complex64)
    out_top = out_modes[..., :mm].reshape(B, Cout, modes1, modes2)
    out_bot = out_modes[..., mm:].reshape(B, Cout, modes1, modes2)

    Wr = W // 2 + 1
    out_ft = jnp.zeros((B, Cout, H, Wr), dtype=jnp.complex64)
    out_ft = out_ft.at[:, :, :modes1, :modes2].set(out_top)
    out_ft = out_ft.at[:, :, H - modes1:, :modes2].set(out_bot)

    return jnp.fft.irfft2(out_ft, s=(H, W))                    # (B, Cout, H, W) float32


def _reference(x, w1, w2, modes1, modes2):
    """Pure-JAX reference reproducing the PyTorch forward (correctness check)."""
    B, Cin, H, W = x.shape
    Cout = w1.shape[1]
    x_ft = jnp.fft.rfft2(x)
    out_ft = jnp.zeros((B, Cout, H, W // 2 + 1), dtype=jnp.complex64)
    out_ft = out_ft.at[:, :, :modes1, :modes2].set(
        jnp.einsum('bixy,ioxy->boxy', x_ft[:, :, :modes1, :modes2], w1))
    out_ft = out_ft.at[:, :, H - modes1:, :modes2].set(
        jnp.einsum('bixy,ioxy->boxy', x_ft[:, :, H - modes1:, :modes2], w2))
    return jnp.fft.irfft2(out_ft, s=(H, W))


if __name__ == "__main__":
    B, Cin, Cout, H, W = 2, 4, 4, 16, 16
    modes1, modes2 = 4, 4

    key = jax.random.PRNGKey(0)
    kx, kw1r, kw1i, kw2r, kw2i = jax.random.split(key, 5)

    x = jax.random.normal(kx, (B, Cin, H, W), dtype=jnp.float32)

    # weights = scale * rand(...) with complex entries (real & imag each U[0,1))
    scale = 1.0 / (Cin * Cout)
    w1_r = scale * jax.random.uniform(kw1r, (Cin, Cout, modes1, modes2), dtype=jnp.float32)
    w1_i = scale * jax.random.uniform(kw1i, (Cin, Cout, modes1, modes2), dtype=jnp.float32)
    w2_r = scale * jax.random.uniform(kw2r, (Cin, Cout, modes1, modes2), dtype=jnp.float32)
    w2_i = scale * jax.random.uniform(kw2i, (Cin, Cout, modes1, modes2), dtype=jnp.float32)

    out = spectral_conv2d(x, w1_r, w1_i, w2_r, w2_i, modes1, modes2)
    out = jax.block_until_ready(out)

    ref = _reference(x, (w1_r + 1j * w1_i).astype(jnp.complex64),
                     (w2_r + 1j * w2_i).astype(jnp.complex64), modes1, modes2)
    ref = jax.block_until_ready(ref)

    assert out.shape == (B, Cout, H, W)
    assert jnp.allclose(out, ref, atol=1e-4, rtol=1e-4), "mismatch vs reference"

    print("KERNEL_OK")
</pallas_src>

<mosaic_0001>
module attributes {stable_mosaic.version = 11 : i64} {
  func.func @_spectral_mul_kernel(%arg0: i32, %arg1: i32, %arg2: memref<2x4x128xf32, #tpu.memory_space<vmem>>, %arg3: memref<2x4x128xf32, #tpu.memory_space<vmem>>, %arg4: memref<4x4x128xf32, #tpu.memory_space<vmem>>, %arg5: memref<4x4x128xf32, #tpu.memory_space<vmem>>, %arg6: memref<2x4x128xf32, #tpu.memory_space<vmem>>, %arg7: memref<2x4x128xf32, #tpu.memory_space<vmem>>) attributes {dimension_semantics = [#tpu.dimension_semantics<parallel>, #tpu.dimension_semantics<parallel>], iteration_bounds = array<i64: 1, 1>, scalar_prefetch = 0 : i64, scratch_operands = 0 : i64, tpu.core_type = #tpu.core_type<tc>, window_params = [{transform_indices = @transform_0, window_bounds = array<i64: 2, 4, 128>}, {transform_indices = @transform_1, window_bounds = array<i64: 2, 4, 128>}, {transform_indices = @transform_2, window_bounds = array<i64: 4, 4, 128>}, {transform_indices = @transform_3, window_bounds = array<i64: 4, 4, 128>}, {transform_indices = @transform_4, window_bounds = array<i64: 2, 4, 128>}, {transform_indices = @transform_5, window_bounds = array<i64: 2, 4, 128>}]} {
    %cst = arith.constant 0.000000e+00 : f32
    %0 = vector.broadcast %cst : f32 to vector<2x4x128xf32>
    %cst_0 = arith.constant 0.000000e+00 : f32
    %1 = vector.broadcast %cst_0 : f32 to vector<2x4x128xf32>
    %c0 = arith.constant 0 : index
    %c0_1 = arith.constant 0 : index
    %c0_2 = arith.constant 0 : index
    %2 = vector.load %arg2[%c0, %c0_1, %c0_2] : memref<2x4x128xf32, #tpu.memory_space<vmem>>, vector<2x1x128xf32>
    %3 = vector.shape_cast %2 : vector<2x1x128xf32> to vector<2x128xf32>
    %4 = vector.shape_cast %3 : vector<2x128xf32> to vector<2x1x128xf32>
    %c0_3 = arith.constant 0 : index
    %c0_4 = arith.constant 0 : index
    %c0_5 = arith.constant 0 : index
    %5 = vector.load %arg3[%c0_3, %c0_4, %c0_5] : memref<2x4x128xf32, #tpu.memory_space<vmem>>, vector<2x1x128xf32>
    %6 = vector.shape_cast %5 : vector<2x1x128xf32> to vector<2x128xf32>
    %7 = vector.shape_cast %6 : vector<2x128xf32> to vector<2x1x128xf32>
    %c0_6 = arith.constant 0 : index
    %c0_7 = arith.constant 0 : index
    %c0_8 = arith.constant 0 : index
    %8 = vector.load %arg4[%c0_6, %c0_7, %c0_8] : memref<4x4x128xf32, #tpu.memory_space<vmem>>, vector<1x4x128xf32>
    %9 = vector.shape_cast %8 : vector<1x4x128xf32> to vector<4x128xf32>
    %10 = vector.shape_cast %9 : vector<4x128xf32> to vector<1x4x128xf32>
    %c0_9 = arith.constant 0 : index
    %c0_10 = arith.constant 0 : index
    %c0_11 = arith.constant 0 : index
    %11 = vector.load %arg5[%c0_9, %c0_10, %c0_11] : memref<4x4x128xf32, #tpu.memory_space<vmem>>, vector<1x4x128xf32>
    %12 = vector.shape_cast %11 : vector<1x4x128xf32> to vector<4x128xf32>
    %13 = vector.shape_cast %12 : vector<4x128xf32> to vector<1x4x128xf32>
    %14 = arith.addf %4, %7 : vector<2x1x128xf32>
    %15 = vector.broadcast %10 : vector<1x4x128xf32> to vector<2x4x128xf32>
    %16 = vector.broadcast %14 : vector<2x1x128xf32> to vector<2x4x128xf32>
    %17 = arith.mulf %15, %16 : vector<2x4x128xf32>
    %18 = arith.addf %10, %13 : vector<1x4x128xf32>
    %19 = vector.broadcast %7 : vector<2x1x128xf32> to vector<2x4x128xf32>
    %20 = vector.broadcast %18 : vector<1x4x128xf32> to vector<2x4x128xf32>
    %21 = arith.mulf %19, %20 : vector<2x4x128xf32>
    %22 = arith.subf %17, %21 : vector<2x4x128xf32>
    %23 = arith.addf %0, %22 : vector<2x4x128xf32>
    %24 = arith.subf %13, %10 : vector<1x4x128xf32>
    %25 = vector.broadcast %4 : vector<2x1x128xf32> to vector<2x4x128xf32>
    %26 = vector.broadcast %24 : vector<1x4x128xf32> to vector<2x4x128xf32>
    %27 = arith.mulf %25, %26 : vector<2x4x128xf32>
    %28 = arith.addf %17, %27 : vector<2x4x128xf32>
    %29 = arith.addf %1, %28 : vector<2x4x128xf32>
    %c0_12 = arith.constant 0 : index
    %c1 = arith.constant 1 : index
    %c0_13 = arith.constant 0 : index
    %30 = vector.load %arg2[%c0_12, %c1, %c0_13] : memref<2x4x128xf32, #tpu.memory_space<vmem>>, vector<2x1x128xf32>
    %31 = vector.shape_cast %30 : vector<2x1x128xf32> to vector<2x128xf32>
    %32 = vector.shape_cast %31 : vector<2x128xf32> to vector<2x1x128xf32>
    %c0_14 = arith.constant 0 : index
    %c1_15 = arith.constant 1 : index
    %c0_16 = arith.constant 0 : index
    %33 = vector.load %arg3[%c0_14, %c1_15, %c0_16] : memref<2x4x128xf32, #tpu.memory_space<vmem>>, vector<2x1x128xf32>
    %34 = vector.shape_cast %33 : vector<2x1x128xf32> to vector<2x128xf32>
    %35 = vector.shape_cast %34 : vector<2x128xf32> to vector<2x1x128xf32>
    %c1_17 = arith.constant 1 : index
    %c0_18 = arith.constant 0 : index
    %c0_19 = arith.constant 0 : index
    %36 = vector.load %arg4[%c1_17, %c0_18, %c0_19] : memref<4x4x128xf32, #tpu.memory_space<vmem>>, vector<1x4x128xf32>
    %37 = vector.shape_cast %36 : vector<1x4x128xf32> to vector<4x128xf32>
    %38 = vector.shape_cast %37 : vector<4x128xf32> to vector<1x4x128xf32>
    %c1_20 = arith.constant 1 : index
    %c0_21 = arith.constant 0 : index
    %c0_22 = arith.constant 0 : index
    %39 = vector.load %arg5[%c1_20, %c0_21, %c0_22] : memref<4x4x128xf32, #tpu.memory_space<vmem>>, vector<1x4x128xf32>
    %40 = vector.shape_cast %39 : vector<1x4x128xf32> to vector<4x128xf32>
    %41 = vector.shape_cast %40 : vector<4x128xf32> to vector<1x4x128xf32>
    %42 = arith.addf %32, %35 : vector<2x1x128xf32>
    %43 = vector.broadcast %38 : vector<1x4x128xf32> to vector<2x4x128xf32>
    %44 = vector.broadcast %42 : vector<2x1x128xf32> to vector<2x4x128xf32>
    %45 = arith.mulf %43, %44 : vector<2x4x128xf32>
    %46 = arith.addf %38, %41 : vector<1x4x128xf32>
    %47 = vector.broadcast %35 : vector<2x1x128xf32> to vector<2x4x128xf32>
    %48 = vector.broadcast %46 : vector<1x4x128xf32> to vector<2x4x128xf32>
    %49 = arith.mulf %47, %48 : vector<2x4x128xf32>
    %50 = arith.subf %45, %49 : vector<2x4x128xf32>
    %51 = arith.addf %23, %50 : vector<2x4x128xf32>
    %52 = arith.subf %41, %38 : vector<1x4x128xf32>
    %53 = vector.broadcast %32 : vector<2x1x128xf32> to vector<2x4x128xf32>
    %54 = vector.broadcast %52 : vector<1x4x128xf32> to vector<2x4x128xf32>
    %55 = arith.mulf %53, %54 : vector<2x4x128xf32>
    %56 = arith.addf %45, %55 : vector<2x4x128xf32>
    %57 = arith.addf %29, %56 : vector<2x4x128xf32>
    %c0_23 = arith.constant 0 : index
    %c2 = arith.constant 2 : index
    %c0_24 = arith.constant 0 : index
    %58 = vector.load %arg2[%c0_23, %c2, %c0_24] : memref<2x4x128xf32, #tpu.memory_space<vmem>>, vector<2x1x128xf32>
    %59 = vector.shape_cast %58 : vector<2x1x128xf32> to vector<2x128xf32>
    %60 = vector.shape_cast %59 : vector<2x128xf32> to vector<2x1x128xf32>
    %c0_25 = arith.constant 0 : index
    %c2_26 = arith.constant 2 : index
    %c0_27 = arith.constant 0 : index
    %61 = vector.load %arg3[%c0_25, %c2_26, %c0_27] : memref<2x4x128xf32, #tpu.memory_space<vmem>>, vector<2x1x128xf32>
    %62 = vector.shape_cast %61 : vector<2x1x128xf32> to vector<2x128xf32>
    %63 = vector.shape_cast %62 : vector<2x128xf32> to vector<2x1x128xf32>
    %c2_28 = arith.constant 2 : index
    %c0_29 = arith.constant 0 : index
    %c0_30 = arith.constant 0 : index
    %64 = vector.load %arg4[%c2_28, %c0_29, %c0_30] : memref<4x4x128xf32, #tpu.memory_space<vmem>>, vector<1x4x128xf32>
    %65 = vector.shape_cast %64 : vector<1x4x128xf32> to vector<4x128xf32>
    %66 = vector.shape_cast %65 : vector<4x128xf32> to vector<1x4x128xf32>
    %c2_31 = arith.constant 2 : index
    %c0_32 = arith.constant 0 : index
    %c0_33 = arith.constant 0 : index
    %67 = vector.load %arg5[%c2_31, %c0_32, %c0_33] : memref<4x4x128xf32, #tpu.memory_space<vmem>>, vector<1x4x128xf32>
    %68 = vector.shape_cast %67 : vector<1x4x128xf32> to vector<4x128xf32>
    %69 = vector.shape_cast %68 : vector<4x128xf32> to vector<1x4x128xf32>
    %70 = arith.addf %60, %63 : vector<2x1x128xf32>
    %71 = vector.broadcast %66 : vector<1x4x128xf32> to vector<2x4x128xf32>
    %72 = vector.broadcast %70 : vector<2x1x128xf32> to vector<2x4x128xf32>
    %73 = arith.mulf %71, %72 : vector<2x4x128xf32>
    %74 = arith.addf %66, %69 : vector<1x4x128xf32>
    %75 = vector.broadcast %63 : vector<2x1x128xf32> to vector<2x4x128xf32>
    %76 = vector.broadcast %74 : vector<1x4x128xf32> to vector<2x4x128xf32>
    %77 = arith.mulf %75, %76 : vector<2x4x128xf32>
    %78 = arith.subf %73, %77 : vector<2x4x128xf32>
    %79 = arith.addf %51, %78 : vector<2x4x128xf32>
    %80 = arith.subf %69, %66 : vector<1x4x128xf32>
    %81 = vector.broadcast %60 : vector<2x1x128xf32> to vector<2x4x128xf32>
    %82 = vector.broadcast %80 : vector<1x4x128xf32> to vector<2x4x128xf32>
    %83 = arith.mulf %81, %82 : vector<2x4x128xf32>
    %84 = arith.addf %73, %83 : vector<2x4x128xf32>
    %85 = arith.addf %57, %84 : vector<2x4x128xf32>
    %c0_34 = arith.constant 0 : index
    %c3 = arith.constant 3 : index
    %c0_35 = arith.constant 0 : index
    %86 = vector.load %arg2[%c0_34, %c3, %c0_35] : memref<2x4x128xf32, #tpu.memory_space<vmem>>, vector<2x1x128xf32>
    %87 = vector.shape_cast %86 : vector<2x1x128xf32> to vector<2x128xf32>
    %88 = vector.shape_cast %87 : vector<2x128xf32> to vector<2x1x128xf32>
    %c0_36 = arith.constant 0 : index
    %c3_37 = arith.constant 3 : index
    %c0_38 = arith.constant 0 : index
    %89 = vector.load %arg3[%c0_36, %c3_37, %c0_38] : memref<2x4x128xf32, #tpu.memory_space<vmem>>, vector<2x1x128xf32>
    %90 = vector.shape_cast %89 : vector<2x1x128xf32> to vector<2x128xf32>
    %91 = vector.shape_cast %90 : vector<2x128xf32> to vector<2x1x128xf32>
    %c3_39 = arith.constant 3 : index
    %c0_40 = arith.constant 0 : index
    %c0_41 = arith.constant 0 : index
    %92 = vector.load %arg4[%c3_39, %c0_40, %c0_41] : memref<4x4x128xf32, #tpu.memory_space<vmem>>, vector<1x4x128xf32>
    %93 = vector.shape_cast %92 : vector<1x4x128xf32> to vector<4x128xf32>
    %94 = vector.shape_cast %93 : vector<4x128xf32> to vector<1x4x128xf32>
    %c3_42 = arith.constant 3 : index
    %c0_43 = arith.constant 0 : index
    %c0_44 = arith.constant 0 : index
    %95 = vector.load %arg5[%c3_42, %c0_43, %c0_44] : memref<4x4x128xf32, #tpu.memory_space<vmem>>, vector<1x4x128xf32>
    %96 = vector.shape_cast %95 : vector<1x4x128xf32> to vector<4x128xf32>
    %97 = vector.shape_cast %96 : vector<4x128xf32> to vector<1x4x128xf32>
    %98 = arith.addf %88, %91 : vector<2x1x128xf32>
    %99 = vector.broadcast %94 : vector<1x4x128xf32> to vector<2x4x128xf32>
    %100 = vector.broadcast %98 : vector<2x1x128xf32> to vector<2x4x128xf32>
    %101 = arith.mulf %99, %100 : vector<2x4x128xf32>
    %102 = arith.addf %94, %97 : vector<1x4x128xf32>
    %103 = vector.broadcast %91 : vector<2x1x128xf32> to vector<2x4x128xf32>
    %104 = vector.broadcast %102 : vector<1x4x128xf32> to vector<2x4x128xf32>
    %105 = arith.mulf %103, %104 : vector<2x4x128xf32>
    %106 = arith.subf %101, %105 : vector<2x4x128xf32>
    %107 = arith.addf %79, %106 : vector<2x4x128xf32>
    %108 = arith.subf %97, %94 : vector<1x4x128xf32>
    %109 = vector.broadcast %88 : vector<2x1x128xf32> to vector<2x4x128xf32>
    %110 = vector.broadcast %108 : vector<1x4x128xf32> to vector<2x4x128xf32>
    %111 = arith.mulf %109, %110 : vector<2x4x128xf32>
    %112 = arith.addf %101, %111 : vector<2x4x128xf32>
    %113 = arith.addf %85, %112 : vector<2x4x128xf32>
    %c0_45 = arith.constant 0 : index
    %c0_46 = arith.constant 0 : index
    %c0_47 = arith.constant 0 : index
    %114 = vector.load %arg6[%c0_45, %c0_46, %c0_47] : memref<2x4x128xf32, #tpu.memory_space<vmem>>, vector<2x4x128xf32>
    tpu.vector_store %arg6[%c0_45, %c0_46, %c0_47], %107 {strides = array<i32>} : memref<2x4x128xf32, #tpu.memory_space<vmem>>, vector<2x4x128xf32>,
    %c0_48 = arith.constant 0 : index
    %c0_49 = arith.constant 0 : index
    %c0_50 = arith.constant 0 : index
    %115 = vector.load %arg7[%c0_48, %c0_49, %c0_50] : memref<2x4x128xf32, #tpu.memory_space<vmem>>, vector<2x4x128xf32>
    tpu.vector_store %arg7[%c0_48, %c0_49, %c0_50], %113 {strides = array<i32>} : memref<2x4x128xf32, #tpu.memory_space<vmem>>, vector<2x4x128xf32>,
    return
  }
  func.func @transform_0(%arg0: i32, %arg1: i32) -> (i32, i32, i32) {
    %c0_i32 = arith.constant 0 : i32
    %c0_i32_0 = arith.constant 0 : i32
    %c0_i32_1 = arith.constant 0 : i32
    return %arg0, %c0_i32, %c0_i32_0 : i32, i32, i32
  }
  func.func @transform_1(%arg0: i32, %arg1: i32) -> (i32, i32, i32) {
    %c0_i32 = arith.constant 0 : i32
    %c0_i32_0 = arith.constant 0 : i32
    %c0_i32_1 = arith.constant 0 : i32
    return %arg0, %c0_i32, %c0_i32_0 : i32, i32, i32
  }
  func.func @transform_2(%arg0: i32, %arg1: i32) -> (i32, i32, i32) {
    %c0_i32 = arith.constant 0 : i32
    %c0_i32_0 = arith.constant 0 : i32
    %c0_i32_1 = arith.constant 0 : i32
    return %c0_i32, %arg1, %c0_i32_0 : i32, i32, i32
  }
  func.func @transform_3(%arg0: i32, %arg1: i32) -> (i32, i32, i32) {
    %c0_i32 = arith.constant 0 : i32
    %c0_i32_0 = arith.constant 0 : i32
    %c0_i32_1 = arith.constant 0 : i32
    return %c0_i32, %arg1, %c0_i32_0 : i32, i32, i32
  }
  func.func @transform_4(%arg0: i32, %arg1: i32) -> (i32, i32, i32) {
    %c0_i32 = arith.constant 0 : i32
    %c0_i32_0 = arith.constant 0 : i32
    return %arg0, %arg1, %c0_i32 : i32, i32, i32
  }
  func.func @transform_5(%arg0: i32, %arg1: i32) -> (i32, i32, i32) {
    %c0_i32 = arith.constant 0 : i32
    %c0_i32_0 = arith.constant 0 : i32
    return %arg0, %arg1, %c0_i32 : i32, i32, i32
  }
}

</mosaic_0001>

<bundles_post_ra>
// kernel: spectral_conv2d.1
= control target key start
LH: loop header
LB: loop body
LE: loop exit
PB: predicated region body
PF: predicated region fallthrough
CT: control target
= control target key end

     0   :  { %v27_v0 = vlaneseq  ;;  %s433_s0 = inlined_call_operand.vmem [shape: f32[2,4,128], index: 0, kind: input, shape index: {}]   ;;  %s434_s1 = inlined_call_operand.vmem [shape: f32[2,4,128], index: 1, kind: input, shape index: {}]   ;;  %s435_s2 = inlined_call_operand.vmem [shape: f32[4,4,128], index: 2, kind: input, shape index: {}]   ;;  %s436_s3 = inlined_call_operand.vmem [shape: f32[4,4,128], index: 3, kind: input, shape index: {}]   ;;  %s437_s4 = inlined_call_operand.vmem [shape: f32[2,4,128], index: 4, kind: output, shape index: {0}]   ;;  %s438_s5 = inlined_call_operand.vmem [shape: f32[2,4,128], index: 5, kind: output, shape index: {1}]  }
   0x1   :  { %v268_v1 = vld [vmem:[%s433_s0] sm:$0x1]  ;;  %v285_v7 = vld [vmem:[%s433_s0 + $0x1] sm:$0x1]  ;;  %v229_v9 = vld [vmem:[%s435_s2 + $0x4] sm:$0xf] }
   0x2   :  { %v21_v2 = vld [vmem:[%s434_s1] sm:$0x1]  ;;  %v28_v6 = vshrl.u32 %v27_v0, 7  ;;  %v69_v8 = vld [vmem:[%s434_s1 + $0x1] sm:$0x1] }
   0x3   :  { %v276_v3 = vld [vmem:[%s435_s2] sm:$0xf]  ;;  %v25_v5 = vadd.f32 %v21_v2, %v268_v1  ;;  %v230_v10 = vld [vmem:[%s436_s3 + $0x4] sm:$0xf]  ;;  %v75_v13 = vadd.f32 %v69_v8, %v285_v7  ;;  %v311_v17 = vld [vmem:[%s435_s2 + $0x8] sm:$0xf] }
   0x4   :  { %v24_v4 = vld [vmem:[%s436_s3] sm:$0xf]  ;;  %v296_v11 = vsub.s32 0, %v28_v6  ;;  %v87_v14 = vadd.f32 %v230_v10, %v229_v9  ;;  %v316_v18 = vld [vmem:[%s436_s3 + $0x8] sm:$0xf]  ;;  %v327_v22 = vsub.f32 %v230_v10, %v229_v9 }
   0x5   :  { %v37_v12 = vadd.f32 %v24_v4, %v276_v3  ;;  %v303_v15 = vld [vmem:[%s433_s0 + $0x2] sm:$0x1]  ;;  %v322_v20 = vld [vmem:[%s433_s0 + $0x3] sm:$0x1]  ;;  %v325_v21 = vsub.f32 %v24_v4, %v276_v3  ;;  %v339_v28 = vld [vmem:[%s435_s2 + $0xc] sm:$0xf]  ;;  %v137_v31 = vadd.f32 %v316_v18, %v311_v17 }
   0x6   :  { %v119_v16 = vld [vmem:[%s434_s1 + $0x2] sm:$0x1]  ;;  %v30_v23 = vrot.slane %v25_v5, %v296_v11  ;;  %v41_v24 = vrot.slane %v21_v2, %v296_v11  ;;  %v80_v25 = vrot.slane %v75_v13, %v296_v11  ;;  %v91_v26 = vrot.slane %v69_v8, %v296_v11  ;;  %v169_v27 = vld [vmem:[%s434_s1 + $0x3] sm:$0x1]  ;;  %v344_v29 = vld [vmem:[%s436_s3 + $0xc] sm:$0xf] }
   0x7   :  { %v125_v19 = vadd.f32 %v119_v16, %v303_v15  ;;  %v141_v32 = vrot.slane %v119_v16, %v296_v11  ;;  %v175_v33 = vadd.f32 %v169_v27, %v322_v20  ;;  %v354_v34 = vld [vmem:[%s433_s0 + $0x4] sm:$0x1]  ;;  %v363_v40 = vld [vmem:[%s433_s0 + $0x5] sm:$0x1]  ;;  %v187_v45 = vadd.f32 %v344_v29, %v339_v28  ;;  %v118_v50 = vld [vmem:[%s433_s0 + $0x6] sm:$0x1] }
   0x8   :  { %v22_v35 = vld [vmem:[%s434_s1 + $0x4] sm:$0x1]  ;;  %v35_v36 = vmul.f32 %v30_v23, %v276_v3  ;;  %v46_v37 = vmul.f32 %v41_v24, %v37_v12  ;;  %v85_v38 = vmul.f32 %v229_v9, %v80_v25  ;;  %v96_v39 = vmul.f32 %v91_v26, %v87_v14  ;;  %v70_v41 = vld [vmem:[%s434_s1 + $0x5] sm:$0x1]  ;;  %v120_v51 = vld [vmem:[%s434_s1 + $0x6] sm:$0x1] }
   0x9   :  { %v130_v30 = vrot.slane %v125_v19, %v296_v11  ;;  %v146_v43 = vmul.f32 %v141_v32, %v137_v31  ;;  %v180_v44 = vrot.slane %v175_v33, %v296_v11  ;;  %v191_v48 = vrot.slane %v169_v27, %v296_v11  ;;  %v168_v60 = vld [vmem:[%s433_s0 + $0x7] sm:$0x1] }
   0xa   :  { %v48_v46 = vsub.f32 %v35_v36, %v46_v37  ;;  %v98_v47 = vsub.f32 %v85_v38, %v96_v39  ;;  %v26_v49 = vadd.f32 %v22_v35, %v354_v34  ;;  %v45_v54 = vrot.slane %v22_v35, %v296_v11  ;;  %v170_v61 = vld [vmem:[%s434_s1 + $0x7] sm:$0x1] }
   0xb   :  { %v135_v42 = vmul.f32 %v311_v17, %v130_v30  ;;  %v185_v53 = vmul.f32 %v339_v28, %v180_v44  ;;  %v76_v55 = vadd.f32 %v70_v41, %v363_v40  ;;  %v196_v57 = vmul.f32 %v191_v48, %v187_v45 }
   0xc   :  { %v100_v56 = vadd.f32 %v98_v47, %v48_v46  ;;  %v34_v58 = vrot.slane %v26_v49, %v296_v11  ;;  %v95_v59 = vrot.slane %v70_v41, %v296_v11  ;;  %v47_v62 = vmul.f32 %v45_v54, %v37_v12 }
   0xd   :  { %v148_v52 = vsub.f32 %v135_v42, %v146_v43  ;;  %v84_v63 = vrot.slane %v76_v55, %v296_v11  ;;  %v126_v0 = vadd.f32 %v120_v51, %v118_v50  ;;  %v145_v2 = vrot.slane %v120_v51, %v296_v11 }
   0xe   :  { %v198_v5 = vsub.f32 %v185_v53, %v196_v57  ;;  %v36_v6 = vmul.f32 %v34_v58, %v276_v3  ;;  %v97_v8 = vmul.f32 %v95_v59, %v87_v14  ;;  %v176_v19 = vadd.f32 %v170_v61, %v168_v60 }
   0xf   :  { %v150_v4 = vadd.f32 %v148_v52, %v100_v56  ;;  %v86_v10 = vmul.f32 %v229_v9, %v84_v63  ;;  %v134_v13 = vrot.slane %v126_v0, %v296_v11  ;;  %v147_v16 = vmul.f32 %v145_v2, %v137_v31 }
  0x10   :  { %v49_v24 = vsub.f32 %v36_v6, %v47_v62  ;;  %v195_v25 = vrot.slane %v170_v61, %v296_v11  ;;  %v56_v12 = vrot.slane %v268_v1, %v296_v11  ;;  %v184_v30 = vrot.slane %v176_v19, %v296_v11 }
  0x11   :  { %v200_v23 = vadd.f32 %v198_v5, %v150_v4  ;;  %v99_v26 = vsub.f32 %v86_v10, %v97_v8  ;;  %v136_v27 = vmul.f32 %v311_v17, %v134_v13  ;;  %v106_v3 = vrot.slane %v285_v7, %v296_v11 }
  0x12   :  { %v197_v9 = vmul.f32 %v195_v25, %v187_v45  ;;  %v61_v14 = vmul.f32 %v56_v12, %v325_v21  ;;  %v152_v31 = vsub.f32 %v316_v18, %v311_v17  ;;  %v156_v1 = vrot.slane %v303_v15, %v296_v11 }
  0x13   :  { %217 = vst [vmem:[%s437_s4] sm:$0xf] %v200_v23  ;;  %v101_v32 = vadd.f32 %v99_v26, %v49_v24  ;;  %v149_v33 = vsub.f32 %v136_v27, %v147_v16  ;;  %v186_v35 = vmul.f32 %v339_v28, %v184_v30  ;;  %v111_v37 = vmul.f32 %v106_v3, %v327_v22 }
  0x14   :  { %v63_v7 = vadd.f32 %v61_v14, %v35_v36  ;;  %v161_v39 = vmul.f32 %v156_v1, %v152_v31  ;;  %v202_v41 = vsub.f32 %v344_v29, %v339_v28  ;;  %v206_v43 = vrot.slane %v322_v20, %v296_v11 }
  0x15   :  { %v151_v44 = vadd.f32 %v149_v33, %v101_v32  ;;  %v199_v45 = vsub.f32 %v186_v35, %v197_v9  ;;  %v113_v17 = vadd.f32 %v111_v37, %v85_v38  ;;  %v60_v15 = vrot.slane %v354_v34, %v296_v11 }
  0x16   :  { %v163_v18 = vadd.f32 %v161_v39, %v135_v42  ;;  %v211_v46 = vmul.f32 %v206_v43, %v202_v41  ;;  %v110_v47 = vrot.slane %v363_v40, %v296_v11  ;;  %v160_v36 = vrot.slane %v118_v50, %v296_v11 }
  0x17   :  { %v201_v48 = vadd.f32 %v199_v45, %v151_v44  ;;  %v115_v49 = vadd.f32 %v113_v17, %v63_v7  ;;  %v62_v28 = vmul.f32 %v60_v15, %v325_v21  ;;  %v210_v29 = vrot.slane %v168_v60, %v296_v11 }
  0x18   :  { %v213_v20 = vadd.f32 %v211_v46, %v185_v53  ;;  %v112_v51 = vmul.f32 %v110_v47, %v327_v22  ;;  %v162_v38 = vmul.f32 %v160_v36, %v152_v31 }
  0x19   :  { %218 = vst [vmem:[%s437_s4 + $0x4] sm:$0xf] %v201_v48  ;;  %v165_v34 = vadd.f32 %v163_v18, %v115_v49  ;;  %v64_v42 = vadd.f32 %v62_v28, %v36_v6  ;;  %v212_v52 = vmul.f32 %v210_v29, %v202_v41 }
  0x1a   :  { %v114_v40 = vadd.f32 %v112_v51, %v86_v10  ;;  %v164_v54 = vadd.f32 %v162_v38, %v136_v27 }
  0x1b   :  { %v215_v50 = vadd.f32 %v213_v20, %v165_v34  ;;  %v214_v56 = vadd.f32 %v212_v52, %v186_v35 }
  0x1c   :  { %v116_v55 = vadd.f32 %v114_v40, %v64_v42 }
  0x1d   :  { %219 = vst [vmem:[%s438_s5] sm:$0xf] %v215_v50 }
  0x1e   :  { %v166_v11 = vadd.f32 %v164_v54, %v116_v55 }
  0x20   :  { %v216_v21 = vadd.f32 %v214_v56, %v166_v11 }
  0x22   :  { %220 = vst [vmem:[%s438_s5 + $0x4] sm:$0xf] %v216_v21 }

// kernel: reverse.0
= control target key start
LH: loop header
LB: loop body
LE: loop exit
PB: predicated region body
PF: predicated region fallthrough
CT: control target
= control target key end

     0   :  { %v71_v3 = vlaneseq  ;;  %v64_v9 = vld [vmem:[#allocation0 + $0x7] ss:$-1 sm:$0xff]  ;;  %v78_v12 = vld [vmem:[#allocation0 + $0x17] ss:$-1 sm:$0xff]  ;;  %s329_s0 = inlined_call_operand.vmem [shape: f32[2,4,16,7], index: 0, kind: input, shape index: {}]   ;;  %s330_s1 = inlined_call_operand.vmem [shape: f32[2,4,16,7], index: 1, kind: output, shape index: {}]  }
   0x1   :  { %v44_v0 = vld [vmem:[%s329_s0] sm:$0xff]  ;;  %v46_v1 = vld [vmem:[%s329_s0 + $0x8] sm:$0xff]  ;;  %v48_v2 = vld [vmem:[%s329_s0 + $0x10] sm:$0xff]  ;;  %v65_v10 = vrot.slane %v64_v9, 1  ;;  %v79_v14 = vrot.slane %v78_v12, 1 }
   0x2   :  { %45 = vst [vmem:[#allocation0 + $0x8] sm:$0xff] %v44_v0  ;;  %47 = vst [vmem:[#allocation0 + $0x18] sm:$0xff] %v46_v1  ;;  %v50_v4 = vld [vmem:[%s329_s0 + $0x18] sm:$0xff]  ;;  %v52_v5 = vld [vmem:[%s329_s0 + $0x20] sm:$0xff]  ;;  %v72_v11 = vshrl.u32 %v71_v3, 7 }
   0x3   :  { %49 = vst [vmem:[#allocation0 + $0x28] sm:$0xff] %v48_v2  ;;  %v54_v6 = vld [vmem:[%s329_s0 + $0x28] sm:$0xff]  ;;  %51 = vst [vmem:[#allocation0 + $0x38] sm:$0xff] %v50_v4  ;;  %v56_v7 = vld [vmem:[%s329_s0 + $0x30] sm:$0xff] }
   0x4   :  { %53 = vst [vmem:[#allocation0 + $0x48] sm:$0xff] %v52_v5  ;;  %55 = vst [vmem:[#allocation0 + $0x58] sm:$0xff] %v54_v6  ;;  %v58_v8 = vld [vmem:[%s329_s0 + $0x38] sm:$0xff]  ;;  %v92_v13 = vld [vmem:[#allocation0 + $0x27] ss:$-1 sm:$0xff]  ;;  %vm73_vm0 = vcmp.lt.s32.totalorder %v72_v11, 7 }
   0x5   :  { %57 = vst [vmem:[#allocation0 + $0x68] sm:$0xff] %v56_v7  ;;  %59 = vst [vmem:[#allocation0 + $0x78] sm:$0xff] %v58_v8  ;;  %v93_v15 = vrot.slane %v92_v13, 1  ;;  %v106_v16 = vld [vmem:[#allocation0 + $0x37] ss:$-1 sm:$0xff] }
   0x6   :  { %66 = vst [vmem:[#allocation1] sm:$0xff] %v65_v10  ;;  %v107_v17 = vrot.slane %v106_v16, 1  ;;  %v120_v18 = vld [vmem:[#allocation0 + $0x47] ss:$-1 sm:$0xff]  ;;  %v134_v19 = vld [vmem:[#allocation0 + $0x57] ss:$-1 sm:$0xff] }
   0x7   :  { %80 = vst [vmem:[#allocation1 + $0x8] sm:$0xff] %v79_v14  ;;  %94 = vst [vmem:[#allocation1 + $0x10] sm:$0xff] %v93_v15  ;;  %v121_v20 = vrot.slane %v120_v18, 1  ;;  %v135_v21 = vrot.slane %v134_v19, 1  ;;  %v148_v22 = vld [vmem:[#allocation0 + $0x67] ss:$-1 sm:$0xff] }
   0x8   :  { %v162_v23 = vld [vmem:[#allocation0 + $0x77] ss:$-1 sm:$0xff]  ;;  %108 = vst [vmem:[#allocation1 + $0x18] sm:$0xff] %v107_v17  ;;  %v149_v24 = vrot.slane %v148_v22, 1 }
   0x9   :  { %v163_v25 = vrot.slane %v162_v23, 1  ;;  %v69_v26 = vld [vmem:[#allocation0 + $0xf] ss:$-1 sm:$0xff]  ;;  %v83_v27 = vld [vmem:[#allocation0 + $0x1f] ss:$-1 sm:$0xff]  ;;  %122 = vst [vmem:[#allocation1 + $0x20] sm:$0xff] %v121_v20 }
   0xa   :  { %v97_v28 = vld [vmem:[#allocation0 + $0x2f] ss:$-1 sm:$0xff]  ;;  %136 = vst [vmem:[#allocation1 + $0x28] sm:$0xff] %v135_v21  ;;  %v70_v29 = vrot.slane %v69_v26, 1  ;;  %v84_v30 = vrot.slane %v83_v27, 1  ;;  %150 = vst [vmem:[#allocation1 + $0x30] sm:$0xff] %v149_v24 }
   0xb   :  { %v98_v31 = vrot.slane %v97_v28, 1  ;;  %v111_v32 = vld [vmem:[#allocation0 + $0x3f] ss:$-1 sm:$0xff]  ;;  %164 = vst [vmem:[#allocation1 + $0x38] sm:$0xff] %v163_v25  ;;  %v125_v34 = vld [vmem:[#allocation0 + $0x4f] ss:$-1 sm:$0xff] }
   0xc   :  { %v112_v33 = vrot.slane %v111_v32, 1  ;;  %v139_v35 = vld [vmem:[#allocation0 + $0x5f] ss:$-1 sm:$0xff]  ;;  %74 = vst.msk [vmem:[#allocation1] sm:$0xff] %vm73_vm0, %v70_v29  ;;  %88 = vst.msk [vmem:[#allocation1 + $0x8] sm:$0xff] %vm73_vm0, %v84_v30  ;;  %v126_v36 = vrot.slane %v125_v34, 1 }
   0xd   :  { %102 = vst.msk [vmem:[#allocation1 + $0x10] sm:$0xff] %vm73_vm0, %v98_v31  ;;  %v140_v37 = vrot.slane %v139_v35, 1  ;;  %v153_v38 = vld [vmem:[#allocation0 + $0x6f] ss:$-1 sm:$0xff]  ;;  %v167_v39 = vld [vmem:[#allocation0 + $0x7f] ss:$-1 sm:$0xff] }
   0xe   :  { %116 = vst.msk [vmem:[#allocation1 + $0x18] sm:$0xff] %vm73_vm0, %v112_v33  ;;  %v154_v40 = vrot.slane %v153_v38, 1  ;;  %v168_v41 = vrot.slane %v167_v39, 1  ;;  %130 = vst.msk [vmem:[#allocation1 + $0x20] sm:$0xff] %vm73_vm0, %v126_v36 }
   0xf   :  { %144 = vst.msk [vmem:[#allocation1 + $0x28] sm:$0xff] %vm73_vm0, %v140_v37 }
  0x10   :  { %158 = vst.msk [vmem:[#allocation1 + $0x30] sm:$0xff] %vm73_vm0, %v154_v40  ;;  %172 = vst.msk [vmem:[#allocation1 + $0x38] sm:$0xff] %vm73_vm0, %v168_v41 }
  0x13   :  { %v214_v42 = vld [vmem:[#allocation1] sm:$0xff]  ;;  %v216_v43 = vld [vmem:[#allocation1 + $0x8] sm:$0xff] }
  0x14   :  { %v218_v44 = vld [vmem:[#allocation1 + $0x10] sm:$0xff]  ;;  %215 = vst [vmem:[%s330_s1] sm:$0xff] %v214_v42  ;;  %217 = vst [vmem:[%s330_s1 + $0x8] sm:$0xff] %v216_v43 }
  0x15   :  { %219 = vst [vmem:[%s330_s1 + $0x10] sm:$0xff] %v218_v44  ;;  %v220_v45 = vld [vmem:[#allocation1 + $0x18] sm:$0xff]  ;;  %v222_v46 = vld [vmem:[#allocation1 + $0x20] sm:$0xff] }
  0x16   :  { %221 = vst [vmem:[%s330_s1 + $0x18] sm:$0xff] %v220_v45  ;;  %v224_v47 = vld [vmem:[#allocation1 + $0x28] sm:$0xff]  ;;  %223 = vst [vmem:[%s330_s1 + $0x20] sm:$0xff] %v222_v46 }
  0x17   :  { %225 = vst [vmem:[%s330_s1 + $0x28] sm:$0xff] %v224_v47  ;;  %v226_v48 = vld [vmem:[#allocation1 + $0x30] sm:$0xff]  ;;  %v228_v49 = vld [vmem:[#allocation1 + $0x38] sm:$0xff] }
  0x18   :  { %227 = vst [vmem:[%s330_s1 + $0x30] sm:$0xff] %v226_v48  ;;  %229 = vst [vmem:[%s330_s1 + $0x38] sm:$0xff] %v228_v49 }

</bundles_post_ra>
